<compile_context>
chip_gen: v6e
topology: v6e:2x2x1
jax: 0.10.0
libtpu: 0.0.40
codegen_flags: <defaults>
</compile_context>

<pallas_src>
import functools

import jax
import jax.numpy as jnp
from jax.experimental import pallas as pl
from jax.experimental.pallas import tpu as pltpu

BN_EPS = 1e-5


def _round_up(x, m):
    return (x + m - 1) // m * m


# --------------------------------------------------------------------------------------
# Fused kernel: 1x1 conv (matmul) + BatchNorm2d batch stats + ReLU (+ max-pool epilogue)
# --------------------------------------------------------------------------------------
def _fused_layer_kernel(x_ref, w_ref, gamma_ref, beta_ref, out_ref,
                        sum_ref, sq_ref, scale_ref, shift_ref,
                        *, tile_n, n_valid, inv_m, last):
    p = pl.program_id(0)   # 0: matmul + stats accumulation, 1: normalize (+pool)
    b = pl.program_id(1)   # batch index
    t = pl.program_id(2)   # row tile within the batch

    # 1x1 Conv2d == row-wise matmul on the MXU; bf16 operands, f32 accumulation.
    y = jnp.dot(x_ref[0], w_ref[...], preferred_element_type=jnp.float32)

    first_step = jnp.logical_and(b == 0, t == 0)

    # ---- phase 0: single-pass per-channel sum / sum-of-squares into VMEM scratch ----
    @pl.when(jnp.logical_and(p == 0, first_step))
    def _init_stats():
        sum_ref[...] = jnp.zeros_like(sum_ref)
        sq_ref[...] = jnp.zeros_like(sq_ref)

    @pl.when(p == 0)
    def _accumulate():
        sum_ref[...] += jnp.sum(y, axis=0, keepdims=True)
        sq_ref[...] += jnp.sum(y * y, axis=0, keepdims=True)

    # ---- phase transition: fold BN into per-channel scale/shift (one FMA per element) ----
    @pl.when(jnp.logical_and(p == 1, first_step))
    def _finalize_stats():
        mean = sum_ref[...] * inv_m
        var = jnp.maximum(sq_ref[...] * inv_m - mean * mean, 0.0)   # biased batch variance
        scale = gamma_ref[...] * jax.lax.rsqrt(var + BN_EPS)
        scale_ref[...] = scale
        shift_ref[...] = beta_ref[...] - mean * scale

    # ---- phase 1: normalize + ReLU (+ fused max-over-N epilogue on the last layer) ----
    @pl.when(p == 1)
    def _normalize():
        act = jnp.maximum(y * scale_ref[...] + shift_ref[...], 0.0)
        # Zero padded rows so they never pollute the next layer's stats or the pooled max.
        row = t * tile_n + jax.lax.broadcasted_iota(jnp.int32, act.shape, 0)
        act = jnp.where(row < n_valid, act, 0.0)
        if last:
            tile_max = jnp.max(act, axis=0, keepdims=True)    # (1, Cout)

            @pl.when(t == 0)
            def _init_pool():
                out_ref[0] = tile_max

            @pl.when(t > 0)
            def _update_pool():
                out_ref[0] = jnp.maximum(out_ref[0], tile_max)
        else:
            out_ref[0] = act.astype(out_ref.dtype)


def _fused_layer_call(x, w, gamma, beta, *, n_valid, m_valid, tile_n, last):
    """x: (B, N_pad, CPin) bf16, w: (CPin, CPout) bf16, gamma/beta: (1, CPout) f32."""
    b_dim, n_pad, cp_in = x.shape
    cp_out = w.shape[1]
    n_tiles = n_pad // tile_n

    kernel = functools.partial(
        _fused_layer_kernel,
        tile_n=tile_n, n_valid=n_valid, inv_m=1.0 / float(m_valid), last=last)

    if last:
        # Only the per-batch pooled max leaves the kernel; the full feature map never hits HBM.
        out_shape = jax.ShapeDtypeStruct((b_dim, 1, cp_out), jnp.float32)
        out_spec = pl.BlockSpec((1, 1, cp_out), lambda p, b, t: (b * p, 0, 0))
        out_bytes = b_dim * cp_out * 4
    else:
        out_shape = jax.ShapeDtypeStruct((b_dim, n_pad, cp_out), jnp.bfloat16)
        # Phase 0 parks the output on block (0,0,0) (no writebacks); phase 1 writes each
        # block exactly once.
        out_spec = pl.BlockSpec((1, tile_n, cp_out), lambda p, b, t: (b * p, t * p, 0))
        out_bytes = b_dim * n_pad * cp_out * 2

    cost = pl.CostEstimate(
        flops=4 * b_dim * n_pad * cp_in * cp_out,          # matmul runs in both passes
        transcendentals=cp_out,                            # rsqrt for the folded BN scale
        bytes_accessed=2 * b_dim * n_pad * cp_in * 2 + cp_in * cp_out * 2 + out_bytes)

    return pl.pallas_call(
        kernel,
        out_shape=out_shape,
        grid_spec=pltpu.PrefetchScalarGridSpec(
            num_scalar_prefetch=0,
            grid=(2, b_dim, n_tiles),
            in_specs=[
                pl.BlockSpec((1, tile_n, cp_in), lambda p, b, t: (b, t, 0)),
                pl.BlockSpec((cp_in, cp_out), lambda p, b, t: (0, 0)),   # resident weights
                pl.BlockSpec((1, cp_out), lambda p, b, t: (0, 0)),
                pl.BlockSpec((1, cp_out), lambda p, b, t: (0, 0)),
            ],
            out_specs=out_spec,
            scratch_shapes=[
                pltpu.VMEM((1, cp_out), jnp.float32),   # per-channel sum
                pltpu.VMEM((1, cp_out), jnp.float32),   # per-channel sum of squares
                pltpu.VMEM((1, cp_out), jnp.float32),   # folded BN scale
                pltpu.VMEM((1, cp_out), jnp.float32),   # folded BN shift
            ],
        ),
        compiler_params=pltpu.CompilerParams(
            # Stats are a global reduction over all rows -> keep the grid sequential.
            dimension_semantics=("arbitrary", "arbitrary", "arbitrary"),
            vmem_limit_bytes=32 * 1024 * 1024,
        ),
        cost_estimate=cost,
    )(x, w, gamma, beta)


# --------------------------------------------------------------------------------------
# Module forward (layout plumbing in plain JAX, hot path in Pallas)
# --------------------------------------------------------------------------------------
def pointnet_set_abstraction_group_all(xyz, points, params):
    """xyz: [B, 3, N], points: [B, D, N] or None -> (new_xyz [B,3,1], new_points_res [B,C',1])."""
    B, _, N = xyz.shape
    grouped = jnp.concatenate([xyz, points], axis=1) if points is not None else xyz  # [B, C0, N]
    c_in = grouped.shape[1]
    x = jnp.transpose(grouped, (0, 2, 1))                    # [B, N, C0] channels-last

    tile_n = min(_round_up(N, 8), 512)                       # rows per pipelined tile
    n_pad = _round_up(N, tile_n)
    cp_in = _round_up(c_in, 128)                             # lane-dense channel padding
    x = jnp.pad(x, ((0, 0), (0, n_pad - N), (0, cp_in - c_in))).astype(jnp.bfloat16)

    num_layers = len(params)
    c_prev, cp_prev = c_in, cp_in
    for i, (w, gamma, beta) in enumerate(params):            # shared-MLP stack
        c_out = w.shape[1]
        cp_out = _round_up(c_out, 128)
        w_p = jnp.pad(w, ((0, cp_prev - c_prev), (0, cp_out - c_out))).astype(jnp.bfloat16)
        g_p = jnp.pad(gamma, (0, cp_out - c_out)).reshape(1, cp_out).astype(jnp.float32)
        b_p = jnp.pad(beta, (0, cp_out - c_out)).reshape(1, cp_out).astype(jnp.float32)
        x = _fused_layer_call(x, w_p, g_p, b_p,
                              n_valid=N, m_valid=B * N, tile_n=tile_n,
                              last=(i == num_layers - 1))
        c_prev, cp_prev = c_out, cp_out

    pooled = x[:, 0, :c_prev]                                # [B, C'] (strip channel padding)
    new_points_res = pooled[:, :, None]                      # [B, C', 1] == torch.max(dim=3)[0]
    new_xyz = jnp.zeros((B, 3, 1), dtype=xyz.dtype)          # group_all branch of forward()
    return new_xyz, new_points_res


def init_params(key, in_channel, mlp, use_xyz=True):
    """Deterministic synthetic params matching Conv2d(Cin,Cout,1) + BatchNorm2d(Cout) shapes.

    The Conv2d bias is omitted: a per-channel constant added before training-mode
    BatchNorm2d is cancelled exactly by the batch-mean subtraction (no-op on the output).
    """
    last = in_channel + (3 if use_xyz else 0)
    params = []
    for out_c in mlp:
        key, kw, kg, kb = jax.random.split(key, 4)
        w = 0.1 * jax.random.normal(kw, (out_c, last, 1, 1), jnp.float32)  # Conv2d weight
        gamma = 1.0 + 0.1 * jax.random.normal(kg, (out_c,), jnp.float32)   # BN weight
        beta = 0.1 * jax.random.normal(kb, (out_c,), jnp.float32)          # BN bias
        params.append((w[:, :, 0, 0].T, gamma, beta))   # ([Cin, Cout], [Cout], [Cout])
        last = out_c
    return params


def _reference_forward(xyz, points, params):
    """Pure-JAX reference with the same numerics (bf16 matmul operands, f32 BN math)."""
    B, _, N = xyz.shape
    grouped = jnp.concatenate([xyz, points], axis=1) if points is not None else xyz
    x = jnp.transpose(grouped, (0, 2, 1)).reshape(B * N, -1)
    for w, gamma, beta in params:
        y = jnp.dot(x.astype(jnp.bfloat16), w.astype(jnp.bfloat16),
                    preferred_element_type=jnp.float32)
        mean = jnp.mean(y, axis=0, keepdims=True)
        var = jnp.maximum(jnp.mean(y * y, axis=0, keepdims=True) - mean * mean, 0.0)
        scale = gamma[None, :] * jax.lax.rsqrt(var + BN_EPS)
        shift = beta[None, :] - mean * scale
        x = jnp.maximum(y * scale + shift, 0.0)
    feat = x.reshape(B, N, -1)
    return jnp.max(feat, axis=1)    # [B, C']


if __name__ == "__main__":
    key = jax.random.PRNGKey(0)
    B, N, D = 2, 64, 4
    mlp = [16, 32, 64]

    k_xyz, k_pts, k_par = jax.random.split(key, 3)
    xyz = jax.random.normal(k_xyz, (B, 3, N), jnp.float32)      # [B, 3, N]
    points = jax.random.normal(k_pts, (B, D, N), jnp.float32)   # [B, D, N]
    params = init_params(k_par, in_channel=D, mlp=mlp, use_xyz=True)

    fwd = jax.jit(pointnet_set_abstraction_group_all)
    new_xyz, new_points_res = fwd(xyz, points, params)
    jax.block_until_ready((new_xyz, new_points_res))

    assert new_xyz.shape == (B, 3, 1)
    assert new_points_res.shape == (B, mlp[-1], 1)

    ref = _reference_forward(xyz, points, params)
    got = new_points_res[:, :, 0]
    max_err = float(jnp.max(jnp.abs(got - ref)))
    assert jnp.allclose(got, ref, atol=2e-2, rtol=2e-2), f"max abs err {max_err}"

    print("KERNEL_OK")
</pallas_src>

<mosaic_0001>
module attributes {stable_mosaic.version = 11 : i64} {
  func.func @_fused_layer_kernel(%arg0: i32, %arg1: i32, %arg2: i32, %arg3: memref<1x64x128xbf16, #tpu.memory_space<vmem>>, %arg4: memref<128x128xbf16, #tpu.memory_space<vmem>>, %arg5: memref<1x128xf32, #tpu.memory_space<vmem>>, %arg6: memref<1x128xf32, #tpu.memory_space<vmem>>, %arg7: memref<1x64x128xbf16, #tpu.memory_space<vmem>>, %arg8: memref<1x128xf32, #tpu.memory_space<vmem>>, %arg9: memref<1x128xf32, #tpu.memory_space<vmem>>, %arg10: memref<1x128xf32, #tpu.memory_space<vmem>>, %arg11: memref<1x128xf32, #tpu.memory_space<vmem>>) attributes {dimension_semantics = [#tpu.dimension_semantics<arbitrary>, #tpu.dimension_semantics<arbitrary>, #tpu.dimension_semantics<arbitrary>], iteration_bounds = array<i64: 2, 2, 1>, scalar_prefetch = 0 : i64, scratch_operands = 4 : i64, tpu.core_type = #tpu.core_type<tc>, window_params = [{transform_indices = @transform_0, window_bounds = array<i64: 1, 64, 128>}, {pipeline_mode = #tpu.pipeline_mode<synchronous>, transform_indices = @transform_1, window_bounds = array<i64: 128, 128>}, {pipeline_mode = #tpu.pipeline_mode<synchronous>, transform_indices = @transform_2, window_bounds = array<i64: 1, 128>}, {pipeline_mode = #tpu.pipeline_mode<synchronous>, transform_indices = @transform_3, window_bounds = array<i64: 1, 128>}, {transform_indices = @transform_4, window_bounds = array<i64: 1, 64, 128>}]} {
    %c0 = arith.constant 0 : index
    %c0_0 = arith.constant 0 : index
    %c0_1 = arith.constant 0 : index
    %0 = vector.load %arg3[%c0, %c0_0, %c0_1] : memref<1x64x128xbf16, #tpu.memory_space<vmem>>, vector<1x64x128xbf16>
    %1 = vector.shape_cast %0 : vector<1x64x128xbf16> to vector<64x128xbf16>
    %c0_2 = arith.constant 0 : index
    %c0_3 = arith.constant 0 : index
    %2 = vector.load %arg4[%c0_2, %c0_3] : memref<128x128xbf16, #tpu.memory_space<vmem>>, vector<128x128xbf16>
    %cst = arith.constant dense<0.000000e+00> : vector<64x128xf32>
    %3 = tpu.matmul %1, %2, %cst {dimension_numbers = #tpu.dot_dimension_numbers<[1], [0], [0], [1], [0, 0, 1, 1], [], []>} : vector<64x128xbf16>, vector<128x128xbf16>, vector<64x128xf32> -> vector<64x128xf32>
    %c0_i32 = arith.constant 0 : i32
    %4 = arith.cmpi eq, %arg1, %c0_i32 : i32
    %c0_i32_4 = arith.constant 0 : i32
    %5 = arith.cmpi eq, %arg2, %c0_i32_4 : i32
    %6 = arith.andi %4, %5 : i1
    %c0_i32_5 = arith.constant 0 : i32
    %7 = arith.cmpi eq, %arg0, %c0_i32_5 : i32
    %8 = arith.andi %7, %6 : i1
    %9 = arith.extui %8 : i1 to i32
    %c0_i32_6 = arith.constant 0 : i32
    %10 = arith.cmpi ne, %9, %c0_i32_6 : i32
    scf.if %10 {
      %cst_12 = arith.constant 0.000000e+00 : f32
      %21 = vector.broadcast %cst_12 : f32 to vector<1x128xf32>
      %c0_13 = arith.constant 0 : index
      %c0_14 = arith.constant 0 : index
      %22 = vector.load %arg8[%c0_13, %c0_14] : memref<1x128xf32, #tpu.memory_space<vmem>>, vector<1x128xf32>
      tpu.vector_store %arg8[%c0_13, %c0_14], %21 {strides = array<i32>} : memref<1x128xf32, #tpu.memory_space<vmem>>, vector<1x128xf32>,
      %cst_15 = arith.constant 0.000000e+00 : f32
      %23 = vector.broadcast %cst_15 : f32 to vector<1x128xf32>
      %c0_16 = arith.constant 0 : index
      %c0_17 = arith.constant 0 : index
      %24 = vector.load %arg9[%c0_16, %c0_17] : memref<1x128xf32, #tpu.memory_space<vmem>>, vector<1x128xf32>
      tpu.vector_store %arg9[%c0_16, %c0_17], %23 {strides = array<i32>} : memref<1x128xf32, #tpu.memory_space<vmem>>, vector<1x128xf32>,
    } else {
    }
    %c0_i32_7 = arith.constant 0 : i32
    %11 = arith.cmpi eq, %arg0, %c0_i32_7 : i32
    %12 = arith.extui %11 : i1 to i32
    %c0_i32_8 = arith.constant 0 : i32
    %13 = arith.cmpi ne, %12, %c0_i32_8 : i32
    scf.if %13 {
      %c0_12 = arith.constant 0 : index
      %c0_13 = arith.constant 0 : index
      %21 = vector.load %arg8[%c0_12, %c0_13] : memref<1x128xf32, #tpu.memory_space<vmem>>, vector<1x128xf32>
      %cst_14 = arith.constant dense<0.000000e+00> : vector<128xf32>
      %22 = vector.multi_reduction <add>, %3, %cst_14 [0] : vector<64x128xf32> to vector<128xf32>
      %23 = vector.shape_cast %22 : vector<128xf32> to vector<1x128xf32>
      %24 = arith.addf %21, %23 : vector<1x128xf32>
      %c0_15 = arith.constant 0 : index
      %c0_16 = arith.constant 0 : index
      %25 = vector.load %arg8[%c0_15, %c0_16] : memref<1x128xf32, #tpu.memory_space<vmem>>, vector<1x128xf32>
      tpu.vector_store %arg8[%c0_15, %c0_16], %24 {strides = array<i32>} : memref<1x128xf32, #tpu.memory_space<vmem>>, vector<1x128xf32>,
      %c0_17 = arith.constant 0 : index
      %c0_18 = arith.constant 0 : index
      %26 = vector.load %arg9[%c0_17, %c0_18] : memref<1x128xf32, #tpu.memory_space<vmem>>, vector<1x128xf32>
      %27 = arith.mulf %3, %3 : vector<64x128xf32>
      %cst_19 = arith.constant dense<0.000000e+00> : vector<128xf32>
      %28 = vector.multi_reduction <add>, %27, %cst_19 [0] : vector<64x128xf32> to vector<128xf32>
      %29 = vector.shape_cast %28 : vector<128xf32> to vector<1x128xf32>
      %30 = arith.addf %26, %29 : vector<1x128xf32>
      %c0_20 = arith.constant 0 : index
      %c0_21 = arith.constant 0 : index
      %31 = vector.load %arg9[%c0_20, %c0_21] : memref<1x128xf32, #tpu.memory_space<vmem>>, vector<1x128xf32>
      tpu.vector_store %arg9[%c0_20, %c0_21], %30 {strides = array<i32>} : memref<1x128xf32, #tpu.memory_space<vmem>>, vector<1x128xf32>,
    } else {
    }
    %c1_i32 = arith.constant 1 : i32
    %14 = arith.cmpi eq, %arg0, %c1_i32 : i32
    %15 = arith.andi %14, %6 : i1
    %16 = arith.extui %15 : i1 to i32
    %c0_i32_9 = arith.constant 0 : i32
    %17 = arith.cmpi ne, %16, %c0_i32_9 : i32
    scf.if %17 {
      %c0_12 = arith.constant 0 : index
      %c0_13 = arith.constant 0 : index
      %21 = vector.load %arg8[%c0_12, %c0_13] : memref<1x128xf32, #tpu.memory_space<vmem>>, vector<1x128xf32>
      %cst_14 = arith.constant 7.812500e-03 : f32
      %22 = vector.broadcast %cst_14 : f32 to vector<1x128xf32>
      %23 = arith.mulf %21, %22 : vector<1x128xf32>
      %c0_15 = arith.constant 0 : index
      %c0_16 = arith.constant 0 : index
      %24 = vector.load %arg9[%c0_15, %c0_16] : memref<1x128xf32, #tpu.memory_space<vmem>>, vector<1x128xf32>
      %cst_17 = arith.constant 7.812500e-03 : f32
      %25 = vector.broadcast %cst_17 : f32 to vector<1x128xf32>
      %26 = arith.mulf %24, %25 : vector<1x128xf32>
      %27 = arith.mulf %23, %23 : vector<1x128xf32>
      %28 = arith.subf %26, %27 : vector<1x128xf32>
      %cst_18 = arith.constant 0.000000e+00 : f32
      %29 = vector.broadcast %cst_18 : f32 to vector<1x128xf32>
      %30 = arith.maximumf %28, %29 : vector<1x128xf32>
      %c0_19 = arith.constant 0 : index
      %c0_20 = arith.constant 0 : index
      %31 = vector.load %arg5[%c0_19, %c0_20] : memref<1x128xf32, #tpu.memory_space<vmem>>, vector<1x128xf32>
      %cst_21 = arith.constant 9.99999974E-6 : f32
      %32 = vector.broadcast %cst_21 : f32 to vector<1x128xf32>
      %33 = arith.addf %30, %32 : vector<1x128xf32>
      %34 = math.rsqrt %33 : vector<1x128xf32>
      %35 = arith.mulf %31, %34 : vector<1x128xf32>
      %c0_22 = arith.constant 0 : index
      %c0_23 = arith.constant 0 : index
      %36 = vector.load %arg10[%c0_22, %c0_23] : memref<1x128xf32, #tpu.memory_space<vmem>>, vector<1x128xf32>
      tpu.vector_store %arg10[%c0_22, %c0_23], %35 {strides = array<i32>} : memref<1x128xf32, #tpu.memory_space<vmem>>, vector<1x128xf32>,
      %c0_24 = arith.constant 0 : index
      %c0_25 = arith.constant 0 : index
      %37 = vector.load %arg6[%c0_24, %c0_25] : memref<1x128xf32, #tpu.memory_space<vmem>>, vector<1x128xf32>
      %38 = arith.mulf %23, %35 : vector<1x128xf32>
      %39 = arith.subf %37, %38 : vector<1x128xf32>
      %c0_26 = arith.constant 0 : index
      %c0_27 = arith.constant 0 : index
      %40 = vector.load %arg11[%c0_26, %c0_27] : memref<1x128xf32, #tpu.memory_space<vmem>>, vector<1x128xf32>
      tpu.vector_store %arg11[%c0_26, %c0_27], %39 {strides = array<i32>} : memref<1x128xf32, #tpu.memory_space<vmem>>, vector<1x128xf32>,
    } else {
    }
    %c1_i32_10 = arith.constant 1 : i32
    %18 = arith.cmpi eq, %arg0, %c1_i32_10 : i32
    %19 = arith.extui %18 : i1 to i32
    %c0_i32_11 = arith.constant 0 : i32
    %20 = arith.cmpi ne, %19, %c0_i32_11 : i32
    scf.if %20 {
      %c0_12 = arith.constant 0 : index
      %c0_13 = arith.constant 0 : index
      %21 = vector.load %arg10[%c0_12, %c0_13] : memref<1x128xf32, #tpu.memory_space<vmem>>, vector<1x128xf32>
      %22 = vector.broadcast %21 : vector<1x128xf32> to vector<64x128xf32>
      %23 = arith.mulf %3, %22 : vector<64x128xf32>
      %c0_14 = arith.constant 0 : index
      %c0_15 = arith.constant 0 : index
      %24 = vector.load %arg11[%c0_14, %c0_15] : memref<1x128xf32, #tpu.memory_space<vmem>>, vector<1x128xf32>
      %25 = vector.broadcast %24 : vector<1x128xf32> to vector<64x128xf32>
      %26 = arith.addf %23, %25 : vector<64x128xf32>
      %cst_16 = arith.constant 0.000000e+00 : f32
      %27 = vector.broadcast %cst_16 : f32 to vector<64x128xf32>
      %28 = arith.maximumf %26, %27 : vector<64x128xf32>
      %c64_i32 = arith.constant 64 : i32
      %29 = arith.muli %arg2, %c64_i32 : i32
      %30 = tpu.iota {dimensions = array<i32: 0>} : vector<64x128xi32>
      %31 = vector.broadcast %29 : i32 to vector<64x128xi32>
      %32 = arith.addi %31, %30 : vector<64x128xi32>
      %c64_i32_17 = arith.constant 64 : i32
      %33 = vector.broadcast %c64_i32_17 : i32 to vector<64x128xi32>
      %34 = arith.cmpi slt, %32, %33 : vector<64x128xi32>
      %cst_18 = arith.constant 0.000000e+00 : f32
      %35 = vector.broadcast %cst_18 : f32 to vector<64x128xf32>
      %36 = arith.select %34, %28, %35 : vector<64x128xi1>, vector<64x128xf32>
      %37 = arith.truncf %36 : vector<64x128xf32> to vector<64x128xbf16>
      %c0_19 = arith.constant 0 : index
      %c0_20 = arith.constant 0 : index
      %c0_21 = arith.constant 0 : index
      %38 = vector.load %arg7[%c0_19, %c0_20, %c0_21] : memref<1x64x128xbf16, #tpu.memory_space<vmem>>, vector<1x64x128xbf16>
      %39 = vector.shape_cast %38 : vector<1x64x128xbf16> to vector<64x128xbf16>
      %40 = vector.shape_cast %37 : vector<64x128xbf16> to vector<1x64x128xbf16>
      tpu.vector_store %arg7[%c0_19, %c0_20, %c0_21], %40 {strides = array<i32>} : memref<1x64x128xbf16, #tpu.memory_space<vmem>>, vector<1x64x128xbf16>,
    } else {
    }
    return
  }
  func.func @transform_0(%arg0: i32, %arg1: i32, %arg2: i32) -> (i32, i32, i32) {
    %c0_i32 = arith.constant 0 : i32
    %c0_i32_0 = arith.constant 0 : i32
    return %arg1, %arg2, %c0_i32 : i32, i32, i32
  }
  func.func @transform_1(%arg0: i32, %arg1: i32, %arg2: i32) -> (i32, i32) {
    %c0_i32 = arith.constant 0 : i32
    %c0_i32_0 = arith.constant 0 : i32
    %c0_i32_1 = arith.constant 0 : i32
    return %c0_i32, %c0_i32_0 : i32, i32
  }
  func.func @transform_2(%arg0: i32, %arg1: i32, %arg2: i32) -> (i32, i32) {
    %c0_i32 = arith.constant 0 : i32
    %c0_i32_0 = arith.constant 0 : i32
    %c0_i32_1 = arith.constant 0 : i32
    return %c0_i32, %c0_i32_0 : i32, i32
  }
  func.func @transform_3(%arg0: i32, %arg1: i32, %arg2: i32) -> (i32, i32) {
    %c0_i32 = arith.constant 0 : i32
    %c0_i32_0 = arith.constant 0 : i32
    %c0_i32_1 = arith.constant 0 : i32
    return %c0_i32, %c0_i32_0 : i32, i32
  }
  func.func @transform_4(%arg0: i32, %arg1: i32, %arg2: i32) -> (i32, i32, i32) {
    %0 = arith.muli %arg1, %arg0 : i32
    %1 = arith.muli %arg2, %arg0 : i32
    %c0_i32 = arith.constant 0 : i32
    %c0_i32_0 = arith.constant 0 : i32
    return %0, %1, %c0_i32 : i32, i32, i32
  }
}

module attributes {stable_mosaic.version = 11 : i64} {
  func.func @_fused_layer_kernel(%arg0: i32, %arg1: i32, %arg2: i32, %arg3: memref<1x64x128xbf16, #tpu.memory_space<vmem>>, %arg4: memref<128x128xbf16, #tpu.memory_space<vmem>>, %arg5: memref<1x128xf32, #tpu.memory_space<vmem>>, %arg6: memref<1x128xf32, #tpu.memory_space<vmem>>, %arg7: memref<1x1x128xf32, #tpu.memory_space<vmem>>, %arg8: memref<1x128xf32, #tpu.memory_space<vmem>>, %arg9: memref<1x128xf32, #tpu.memory_space<vmem>>, %arg10: memref<1x128xf32, #tpu.memory_space<vmem>>, %arg11: memref<1x128xf32, #tpu.memory_space<vmem>>) attributes {dimension_semantics = [#tpu.dimension_semantics<arbitrary>, #tpu.dimension_semantics<arbitrary>, #tpu.dimension_semantics<arbitrary>], iteration_bounds = array<i64: 2, 2, 1>, scalar_prefetch = 0 : i64, scratch_operands = 4 : i64, tpu.core_type = #tpu.core_type<tc>, window_params = [{transform_indices = @transform_0, window_bounds = array<i64: 1, 64, 128>}, {pipeline_mode = #tpu.pipeline_mode<synchronous>, transform_indices = @transform_1, window_bounds = array<i64: 128, 128>}, {pipeline_mode = #tpu.pipeline_mode<synchronous>, transform_indices = @transform_2, window_bounds = array<i64: 1, 128>}, {pipeline_mode = #tpu.pipeline_mode<synchronous>, transform_indices = @transform_3, window_bounds = array<i64: 1, 128>}, {transform_indices = @transform_4, window_bounds = array<i64: 1, 1, 128>}]} {
    %c0 = arith.constant 0 : index
    %c0_0 = arith.constant 0 : index
    %c0_1 = arith.constant 0 : index
    %0 = vector.load %arg3[%c0, %c0_0, %c0_1] : memref<1x64x128xbf16, #tpu.memory_space<vmem>>, vector<1x64x128xbf16>
    %1 = vector.shape_cast %0 : vector<1x64x128xbf16> to vector<64x128xbf16>
    %c0_2 = arith.constant 0 : index
    %c0_3 = arith.constant 0 : index
    %2 = vector.load %arg4[%c0_2, %c0_3] : memref<128x128xbf16, #tpu.memory_space<vmem>>, vector<128x128xbf16>
    %cst = arith.constant dense<0.000000e+00> : vector<64x128xf32>
    %3 = tpu.matmul %1, %2, %cst {dimension_numbers = #tpu.dot_dimension_numbers<[1], [0], [0], [1], [0, 0, 1, 1], [], []>} : vector<64x128xbf16>, vector<128x128xbf16>, vector<64x128xf32> -> vector<64x128xf32>
    %c0_i32 = arith.constant 0 : i32
    %4 = arith.cmpi eq, %arg1, %c0_i32 : i32
    %c0_i32_4 = arith.constant 0 : i32
    %5 = arith.cmpi eq, %arg2, %c0_i32_4 : i32
    %6 = arith.andi %4, %5 : i1
    %c0_i32_5 = arith.constant 0 : i32
    %7 = arith.cmpi eq, %arg0, %c0_i32_5 : i32
    %8 = arith.andi %7, %6 : i1
    %9 = arith.extui %8 : i1 to i32
    %c0_i32_6 = arith.constant 0 : i32
    %10 = arith.cmpi ne, %9, %c0_i32_6 : i32
    scf.if %10 {
      %cst_12 = arith.constant 0.000000e+00 : f32
      %21 = vector.broadcast %cst_12 : f32 to vector<1x128xf32>
      %c0_13 = arith.constant 0 : index
      %c0_14 = arith.constant 0 : index
      %22 = vector.load %arg8[%c0_13, %c0_14] : memref<1x128xf32, #tpu.memory_space<vmem>>, vector<1x128xf32>
      tpu.vector_store %arg8[%c0_13, %c0_14], %21 {strides = array<i32>} : memref<1x128xf32, #tpu.memory_space<vmem>>, vector<1x128xf32>,
      %cst_15 = arith.constant 0.000000e+00 : f32
      %23 = vector.broadcast %cst_15 : f32 to vector<1x128xf32>
      %c0_16 = arith.constant 0 : index
      %c0_17 = arith.constant 0 : index
      %24 = vector.load %arg9[%c0_16, %c0_17] : memref<1x128xf32, #tpu.memory_space<vmem>>, vector<1x128xf32>
      tpu.vector_store %arg9[%c0_16, %c0_17], %23 {strides = array<i32>} : memref<1x128xf32, #tpu.memory_space<vmem>>, vector<1x128xf32>,
    } else {
    }
    %c0_i32_7 = arith.constant 0 : i32
    %11 = arith.cmpi eq, %arg0, %c0_i32_7 : i32
    %12 = arith.extui %11 : i1 to i32
    %c0_i32_8 = arith.constant 0 : i32
    %13 = arith.cmpi ne, %12, %c0_i32_8 : i32
    scf.if %13 {
      %c0_12 = arith.constant 0 : index
      %c0_13 = arith.constant 0 : index
      %21 = vector.load %arg8[%c0_12, %c0_13] : memref<1x128xf32, #tpu.memory_space<vmem>>, vector<1x128xf32>
      %cst_14 = arith.constant dense<0.000000e+00> : vector<128xf32>
      %22 = vector.multi_reduction <add>, %3, %cst_14 [0] : vector<64x128xf32> to vector<128xf32>
      %23 = vector.shape_cast %22 : vector<128xf32> to vector<1x128xf32>
      %24 = arith.addf %21, %23 : vector<1x128xf32>
      %c0_15 = arith.constant 0 : index
      %c0_16 = arith.constant 0 : index
      %25 = vector.load %arg8[%c0_15, %c0_16] : memref<1x128xf32, #tpu.memory_space<vmem>>, vector<1x128xf32>
      tpu.vector_store %arg8[%c0_15, %c0_16], %24 {strides = array<i32>} : memref<1x128xf32, #tpu.memory_space<vmem>>, vector<1x128xf32>,
      %c0_17 = arith.constant 0 : index
      %c0_18 = arith.constant 0 : index
      %26 = vector.load %arg9[%c0_17, %c0_18] : memref<1x128xf32, #tpu.memory_space<vmem>>, vector<1x128xf32>
      %27 = arith.mulf %3, %3 : vector<64x128xf32>
      %cst_19 = arith.constant dense<0.000000e+00> : vector<128xf32>
      %28 = vector.multi_reduction <add>, %27, %cst_19 [0] : vector<64x128xf32> to vector<128xf32>
      %29 = vector.shape_cast %28 : vector<128xf32> to vector<1x128xf32>
      %30 = arith.addf %26, %29 : vector<1x128xf32>
      %c0_20 = arith.constant 0 : index
      %c0_21 = arith.constant 0 : index
      %31 = vector.load %arg9[%c0_20, %c0_21] : memref<1x128xf32, #tpu.memory_space<vmem>>, vector<1x128xf32>
      tpu.vector_store %arg9[%c0_20, %c0_21], %30 {strides = array<i32>} : memref<1x128xf32, #tpu.memory_space<vmem>>, vector<1x128xf32>,
    } else {
    }
    %c1_i32 = arith.constant 1 : i32
    %14 = arith.cmpi eq, %arg0, %c1_i32 : i32
    %15 = arith.andi %14, %6 : i1
    %16 = arith.extui %15 : i1 to i32
    %c0_i32_9 = arith.constant 0 : i32
    %17 = arith.cmpi ne, %16, %c0_i32_9 : i32
    scf.if %17 {
      %c0_12 = arith.constant 0 : index
      %c0_13 = arith.constant 0 : index
      %21 = vector.load %arg8[%c0_12, %c0_13] : memref<1x128xf32, #tpu.memory_space<vmem>>, vector<1x128xf32>
      %cst_14 = arith.constant 7.812500e-03 : f32
      %22 = vector.broadcast %cst_14 : f32 to vector<1x128xf32>
      %23 = arith.mulf %21, %22 : vector<1x128xf32>
      %c0_15 = arith.constant 0 : index
      %c0_16 = arith.constant 0 : index
      %24 = vector.load %arg9[%c0_15, %c0_16] : memref<1x128xf32, #tpu.memory_space<vmem>>, vector<1x128xf32>
      %cst_17 = arith.constant 7.812500e-03 : f32
      %25 = vector.broadcast %cst_17 : f32 to vector<1x128xf32>
      %26 = arith.mulf %24, %25 : vector<1x128xf32>
      %27 = arith.mulf %23, %23 : vector<1x128xf32>
      %28 = arith.subf %26, %27 : vector<1x128xf32>
      %cst_18 = arith.constant 0.000000e+00 : f32
      %29 = vector.broadcast %cst_18 : f32 to vector<1x128xf32>
      %30 = arith.maximumf %28, %29 : vector<1x128xf32>
      %c0_19 = arith.constant 0 : index
      %c0_20 = arith.constant 0 : index
      %31 = vector.load %arg5[%c0_19, %c0_20] : memref<1x128xf32, #tpu.memory_space<vmem>>, vector<1x128xf32>
      %cst_21 = arith.constant 9.99999974E-6 : f32
      %32 = vector.broadcast %cst_21 : f32 to vector<1x128xf32>
      %33 = arith.addf %30, %32 : vector<1x128xf32>
      %34 = math.rsqrt %33 : vector<1x128xf32>
      %35 = arith.mulf %31, %34 : vector<1x128xf32>
      %c0_22 = arith.constant 0 : index
      %c0_23 = arith.constant 0 : index
      %36 = vector.load %arg10[%c0_22, %c0_23] : memref<1x128xf32, #tpu.memory_space<vmem>>, vector<1x128xf32>
      tpu.vector_store %arg10[%c0_22, %c0_23], %35 {strides = array<i32>} : memref<1x128xf32, #tpu.memory_space<vmem>>, vector<1x128xf32>,
      %c0_24 = arith.constant 0 : index
      %c0_25 = arith.constant 0 : index
      %37 = vector.load %arg6[%c0_24, %c0_25] : memref<1x128xf32, #tpu.memory_space<vmem>>, vector<1x128xf32>
      %38 = arith.mulf %23, %35 : vector<1x128xf32>
      %39 = arith.subf %37, %38 : vector<1x128xf32>
      %c0_26 = arith.constant 0 : index
      %c0_27 = arith.constant 0 : index
      %40 = vector.load %arg11[%c0_26, %c0_27] : memref<1x128xf32, #tpu.memory_space<vmem>>, vector<1x128xf32>
      tpu.vector_store %arg11[%c0_26, %c0_27], %39 {strides = array<i32>} : memref<1x128xf32, #tpu.memory_space<vmem>>, vector<1x128xf32>,
    } else {
    }
    %c1_i32_10 = arith.constant 1 : i32
    %18 = arith.cmpi eq, %arg0, %c1_i32_10 : i32
    %19 = arith.extui %18 : i1 to i32
    %c0_i32_11 = arith.constant 0 : i32
    %20 = arith.cmpi ne, %19, %c0_i32_11 : i32
    scf.if %20 {
      %c0_12 = arith.constant 0 : index
      %c0_13 = arith.constant 0 : index
      %21 = vector.load %arg10[%c0_12, %c0_13] : memref<1x128xf32, #tpu.memory_space<vmem>>, vector<1x128xf32>
      %22 = vector.broadcast %21 : vector<1x128xf32> to vector<64x128xf32>
      %23 = arith.mulf %3, %22 : vector<64x128xf32>
      %c0_14 = arith.constant 0 : index
      %c0_15 = arith.constant 0 : index
      %24 = vector.load %arg11[%c0_14, %c0_15] : memref<1x128xf32, #tpu.memory_space<vmem>>, vector<1x128xf32>
      %25 = vector.broadcast %24 : vector<1x128xf32> to vector<64x128xf32>
      %26 = arith.addf %23, %25 : vector<64x128xf32>
      %cst_16 = arith.constant 0.000000e+00 : f32
      %27 = vector.broadcast %cst_16 : f32 to vector<64x128xf32>
      %28 = arith.maximumf %26, %27 : vector<64x128xf32>
      %c64_i32 = arith.constant 64 : i32
      %29 = arith.muli %arg2, %c64_i32 : i32
      %30 = tpu.iota {dimensions = array<i32: 0>} : vector<64x128xi32>
      %31 = vector.broadcast %29 : i32 to vector<64x128xi32>
      %32 = arith.addi %31, %30 : vector<64x128xi32>
      %c64_i32_17 = arith.constant 64 : i32
      %33 = vector.broadcast %c64_i32_17 : i32 to vector<64x128xi32>
      %34 = arith.cmpi slt, %32, %33 : vector<64x128xi32>
      %cst_18 = arith.constant 0.000000e+00 : f32
      %35 = vector.broadcast %cst_18 : f32 to vector<64x128xf32>
      %36 = arith.select %34, %28, %35 : vector<64x128xi1>, vector<64x128xf32>
      %cst_19 = arith.constant dense<0xFF800000> : vector<128xf32>
      %37 = vector.multi_reduction <maximumf>, %36, %cst_19 [0] : vector<64x128xf32> to vector<128xf32>
      %38 = vector.shape_cast %37 : vector<128xf32> to vector<1x128xf32>
      %c0_i32_20 = arith.constant 0 : i32
      %39 = arith.cmpi eq, %arg2, %c0_i32_20 : i32
      %40 = arith.extui %39 : i1 to i32
      %c0_i32_21 = arith.constant 0 : i32
      %41 = arith.cmpi ne, %40, %c0_i32_21 : i32
      scf.if %41 {
        %c0_24 = arith.constant 0 : index
        %c0_25 = arith.constant 0 : index
        %c0_26 = arith.constant 0 : index
        %45 = vector.load %arg7[%c0_24, %c0_25, %c0_26] : memref<1x1x128xf32, #tpu.memory_space<vmem>>, vector<1x1x128xf32>
        %46 = vector.shape_cast %45 : vector<1x1x128xf32> to vector<1x128xf32>
        %47 = vector.shape_cast %38 : vector<1x128xf32> to vector<1x1x128xf32>
        tpu.vector_store %arg7[%c0_24, %c0_25, %c0_26], %47 {strides = array<i32>} : memref<1x1x128xf32, #tpu.memory_space<vmem>>, vector<1x1x128xf32>,
      } else {
      }
      %c0_i32_22 = arith.constant 0 : i32
      %42 = arith.cmpi sgt, %arg2, %c0_i32_22 : i32
      %43 = arith.extui %42 : i1 to i32
      %c0_i32_23 = arith.constant 0 : i32
      %44 = arith.cmpi ne, %43, %c0_i32_23 : i32
      scf.if %44 {
        %c0_24 = arith.constant 0 : index
        %c0_25 = arith.constant 0 : index
        %c0_26 = arith.constant 0 : index
        %45 = vector.load %arg7[%c0_24, %c0_25, %c0_26] : memref<1x1x128xf32, #tpu.memory_space<vmem>>, vector<1x1x128xf32>
        %46 = vector.shape_cast %45 : vector<1x1x128xf32> to vector<1x128xf32>
        %47 = arith.maximumf %46, %38 : vector<1x128xf32>
        %c0_27 = arith.constant 0 : index
        %c0_28 = arith.constant 0 : index
        %c0_29 = arith.constant 0 : index
        %48 = vector.load %arg7[%c0_27, %c0_28, %c0_29] : memref<1x1x128xf32, #tpu.memory_space<vmem>>, vector<1x1x128xf32>
        %49 = vector.shape_cast %48 : vector<1x1x128xf32> to vector<1x128xf32>
        %50 = vector.shape_cast %47 : vector<1x128xf32> to vector<1x1x128xf32>
        tpu.vector_store %arg7[%c0_27, %c0_28, %c0_29], %50 {strides = array<i32>} : memref<1x1x128xf32, #tpu.memory_space<vmem>>, vector<1x1x128xf32>,
      } else {
      }
    } else {
    }
    return
  }
  func.func @transform_0(%arg0: i32, %arg1: i32, %arg2: i32) -> (i32, i32, i32) {
    %c0_i32 = arith.constant 0 : i32
    %c0_i32_0 = arith.constant 0 : i32
    return %arg1, %arg2, %c0_i32 : i32, i32, i32
  }
  func.func @transform_1(%arg0: i32, %arg1: i32, %arg2: i32) -> (i32, i32) {
    %c0_i32 = arith.constant 0 : i32
    %c0_i32_0 = arith.constant 0 : i32
    %c0_i32_1 = arith.constant 0 : i32
    return %c0_i32, %c0_i32_0 : i32, i32
  }
  func.func @transform_2(%arg0: i32, %arg1: i32, %arg2: i32) -> (i32, i32) {
    %c0_i32 = arith.constant 0 : i32
    %c0_i32_0 = arith.constant 0 : i32
    %c0_i32_1 = arith.constant 0 : i32
    return %c0_i32, %c0_i32_0 : i32, i32
  }
  func.func @transform_3(%arg0: i32, %arg1: i32, %arg2: i32) -> (i32, i32) {
    %c0_i32 = arith.constant 0 : i32
    %c0_i32_0 = arith.constant 0 : i32
    %c0_i32_1 = arith.constant 0 : i32
    return %c0_i32, %c0_i32_0 : i32, i32
  }
  func.func @transform_4(%arg0: i32, %arg1: i32, %arg2: i32) -> (i32, i32, i32) {
    %0 = arith.muli %arg1, %arg0 : i32
    %c0_i32 = arith.constant 0 : i32
    %c0_i32_0 = arith.constant 0 : i32
    %c0_i32_1 = arith.constant 0 : i32
    return %0, %c0_i32, %c0_i32_0 : i32, i32, i32
  }
}

</mosaic_0001>

<bundles_post_ra>
// kernel: pointnet_set_abstraction_group_all.3
= control target key start
LH: loop header
LB: loop body
LE: loop exit
PB: predicated region body
PF: predicated region fallthrough
CT: control target
= control target key end

     0   :  { %s949_s15 = smov 0   ;;  %s951_s16 = smov 0   ;;  %s1107_s0 = inlined_call_operand.vmem [shape: bf16[2,64,128], index: 0, kind: input, shape index: {}]   ;;  %s1108_s1 = inlined_call_operand.vmem [shape: bf16[128,128], index: 1, kind: input, shape index: {}]   ;;  %s1109_s2 = inlined_call_operand.vmem [shape: f32[1,128], index: 2, kind: input, shape index: {}]   ;;  %s1110_s3 = inlined_call_operand.vmem [shape: f32[1,128], index: 3, kind: input, shape index: {}]   ;;  %s1111_s4 = inlined_call_operand.vmem [shape: bf16[2,64,128], index: 4, kind: output, shape index: {}]  }
   0x1   :  { %s953_s17 = smov 0   ;;  %s955_s18 = smov 0  }
   0x2   :  { %s957_s19 = smov 0  }
   0x3 LB: > { %s29_s20 = sadd.s32 1, %s913_s17  ;;  %s33_s21 = sadd.s32 1, %s917_s18  ;;  %s921_s19 = sphi %s957_s19, %s14_s19   ;;  %s917_s18 = sphi %s955_s18, %s1115_s18   ;;  %s913_s17 = sphi %s953_s17, %s1114_s17   ;;  %s909_s16 = sphi %s951_s16, %s1113_s16   ;;  %s905_s15 = sphi %s949_s15, %s1112_s15  }
   0x4   : > { %p31_p0 = scmp.ge.s32.totalorder %s29_s20, 2  ;;  %p710_p1 = scmp.ge.s32.totalorder %s921_s19, 1 }
   0x5   : > { %p194_p2 = scmp.lt.s32.totalorder %s921_s19, 5 }
   0x6   : > { %s1117_s20 = smov (%p31_p0, %s29_s20), 0  ;;  %s1119_s21 = smov (!%p31_p0, %s33_s21), %s917_s18 }
   0x7   : > { %p195_p3 = pnand %p710_p1, %p194_p2  ;;  %p35_p4 = scmp.ge.s32.totalorder %s1119_s21, 2 }
   0x8   : > { %s240_s22 = smul.u32 (!%p195_p3), %s905_s15, %s909_s16  ;;  %p231_p5 = scmp.lt.s32.totalorder (!%p195_p3), %s905_s15, 1 }
   0x9   : > { %s1121_s21 = smov (%p35_p4, %s1119_s21), 0  ;;  %198 = sbr.rel (%p195_p3) target bundleno = 345 (0x159), region = 36 }
   0xa   : > { %p243_p6 = scmp.lt.s32.totalorder (!%p195_p3), %s240_s22, 1  ;;  %p416_p7 = scmp.eq.s32.totalorder (!%p195_p3), %s905_s15, 0 }
   0xb   : > { %p420_p8 = scmp.eq.s32.totalorder (!%p195_p3), %s909_s16, 0 }
   0xd   : > { %p421_p9 = pnand (!%p195_p3), %p420_p8, %p416_p7 }
   0xe   : > { %v869_v0 = vld [vmem:[%s1108_s1 + $0x38] sm:$0xff]   ;;  %v870_v1 = vld [vmem:[%s1108_s1 + $0x30] sm:$0xff]   ;;  %s232_s27 = scalar_select %p231_p5, %s905_s15, 1  ;;  %v871_v2 = vld [vmem:[%s1108_s1 + $0x28] sm:$0xff]  }
   0xf   : > { %788 = vmatprep.subr.bf16.mxu0 %v869_v0  ;;  %812 = vmatprep.subr.bf16.mxu1 %v869_v0  ;;  %s1123_s22 = smov (!%p243_p6, %s240_s22), 1  ;;  %v872_v3 = vld [vmem:[%s1108_s1 + $0x20] sm:$0xff]   ;;  %v873_v6 = vld [vmem:[%s1108_s1 + $0x18] sm:$0xff]   ;;  %v874_v7 = vld [vmem:[%s1108_s1 + $0x10] sm:$0xff]  }
  0x10   : > { %789 = vmatpush3.bf16.msra.mxu0 %v869_v0  ;;  %820 = vmatpush3.bf16.msra.mxu1 %v869_v0  ;;  %s742_s30 = sshll.u32 %s232_s27, 5  ;;  %s743_s5 = sshll.u32 %s1123_s22, 5  ;;  %v875_v8 = vld [vmem:[%s1108_s1 + $0x8] sm:$0xff]   ;;  %v876_v9 = vld [vmem:[%s1108_s1] sm:$0xff]  }
  0x11   : > { %790 = vmatprep.subr.bf16.mxu0 %v870_v1  ;;  %813 = vmatprep.subr.bf16.mxu1 %v870_v1  ;;  %s999_s8 = scalar_lea.vmem %s1107_s0, %s742_s30  ;;  %s1004_s11 = scalar_lea.vmem %s1111_s4, %s743_s5 }
  0x12   : > { %v877_v4 = vld [vmem:[%s999_s8] sm:$0xff]   ;;  %v878_v5 = vld [vmem:[%s999_s8 + $0x10] sm:$0xff]   ;;  %v879_v10 = vld [vmem:[%s999_s8 + $0x8] sm:$0xff]  }
  0x13   : > { %804 = vmatprep.mubr.bf16.mxu0 %v877_v4  ;;  %808 = vmatprep.mubr.bf16.mxu1 %v878_v5  ;;  %v880_v11 = vld [vmem:[%s999_s8 + $0x18] sm:$0xff]  }
  0x14   : > { %791 = vmatpush3.bf16.msra.mxu0 %v870_v1  ;;  %821 = vmatpush3.bf16.msra.mxu1 %v870_v1 }
  0x15   : > { %792 = vmatprep.subr.bf16.mxu0 %v871_v2  ;;  %814 = vmatprep.subr.bf16.mxu1 %v871_v2 }
  0x18   : > { %793 = vmatpush3.bf16.msra.mxu0 %v871_v2  ;;  %822 = vmatpush3.bf16.msra.mxu1 %v871_v2 }
  0x19   : > { %794 = vmatprep.subr.bf16.mxu0 %v872_v3  ;;  %815 = vmatprep.subr.bf16.mxu1 %v872_v3 }
  0x1c   : > { %795 = vmatpush3.bf16.msra.mxu0 %v872_v3  ;;  %823 = vmatpush3.bf16.msra.mxu1 %v872_v3 }
  0x1d   : > { %796 = vmatprep.subr.bf16.mxu0 %v873_v6  ;;  %816 = vmatprep.subr.bf16.mxu1 %v873_v6 }
  0x20   : > { %797 = vmatpush3.bf16.msra.mxu0 %v873_v6  ;;  %824 = vmatpush3.bf16.msra.mxu1 %v873_v6 }
  0x21   : > { %798 = vmatprep.subr.bf16.mxu0 %v874_v7  ;;  %817 = vmatprep.subr.bf16.mxu1 %v874_v7 }
  0x24   : > { %799 = vmatpush3.bf16.msra.mxu0 %v874_v7  ;;  %825 = vmatpush3.bf16.msra.mxu1 %v874_v7 }
  0x25   : > { %800 = vmatprep.subr.bf16.mxu0 %v875_v8  ;;  %818 = vmatprep.subr.bf16.mxu1 %v875_v8 }
  0x28   : > { %801 = vmatpush3.bf16.msra.mxu0 %v875_v8  ;;  %826 = vmatpush3.bf16.msra.mxu1 %v875_v8 }
  0x29   : > { %802 = vmatprep.subr.bf16.mxu0 %v876_v9  ;;  %819 = vmatprep.subr.bf16.mxu1 %v876_v9 }
  0x2c   : > { %803 = vmatpush3.bf16.msra.mxu0 %v876_v9  ;;  %827 = vmatpush3.bf16.msra.mxu1 %v876_v9 }
  0x2f   : > { %805 = vmatmul.mubr.bf16.vlgmr.msra.gmra.mxu0 %v879_v10  ;;  %809 = vmatmul.mubr.bf16.vlgmr.msra.gmra.mxu1 %v880_v11 }
  0xef   : > { %v1029_v12 = vpop.f32.mrf.mxu0  ;;  %v1031_v13 = vpop.f32.mrf.mxu1 }
  0xf1   : > { %v1033_v14 = vpop.f32.mrf.mxu0  ;;  %v1035_v15 = vpop.f32.mrf.mxu1  ;;  %424 = sbr.rel (%p421_p9) target bundleno = 248 (0xf8), region = 40 }
  0xf3   : > { %v1037_v16 = vpop.f32.mrf.mxu0  ;;  %v1039_v17 = vpop.f32.mrf.mxu1 }
  0xf5   : > { %v1041_v18 = vpop.f32.mrf.mxu0  ;;  %v1043_v19 = vpop.f32.mrf.mxu1 }
  0xf6   : > { %v923_v20 = vmov 0.0  }
  0xf7   : > { %425 = vst [vmem:[#allocation2] sm:$0x1] %v923_v20  ;;  %426 = vst [vmem:[#allocation3] sm:$0x1] %v923_v20 }
  0xf8 PF: > { %p728_p10 = scmp.ne.s32.totalorder %s909_s16, 0 }
  0xfa   : > { %429 = sbr.rel (%p728_p10) target bundleno = 286 (0x11e), region = 44 }
  0xff   : > { %v431_v21 = vadd.f32 %v1041_v18, %v1033_v14  ;;  %v447_v22 = vmul.f32 %v1033_v14, %v1033_v14  ;;  %v448_v23 = vmul.f32 %v1041_v18, %v1041_v18  ;;  %v449_v24 = vmul.f32 %v1029_v12, %v1029_v12  ;;  %v430_v52 = vld [vmem:[#allocation2] sm:$0x1]  ;;  %v446_v55 = vld [vmem:[#allocation3] sm:$0x1] }
 0x100   : > { %v450_v26 = vmul.f32 %v1037_v16, %v1037_v16  ;;  %v451_v29 = vmul.f32 %v1035_v15, %v1035_v15  ;;  %v452_v32 = vmul.f32 %v1043_v19, %v1043_v19  ;;  %v453_v35 = vmul.f32 %v1031_v13, %v1031_v13 }
 0x101   : > { %v432_v25 = vadd.f32 %v1029_v12, %v431_v21  ;;  %v455_v27 = vadd.f32 %v448_v23, %v447_v22  ;;  %v454_v38 = vmul.f32 %v1039_v17, %v1039_v17 }
 0x103   : > { %v433_v28 = vadd.f32 %v1037_v16, %v432_v25  ;;  %v456_v30 = vadd.f32 %v455_v27, %v449_v24 }
 0x105   : > { %v434_v31 = vadd.f32 %v433_v28, %v1035_v15  ;;  %v457_v33 = vadd.f32 %v456_v30, %v450_v26 }
 0x107   : > { %v435_v34 = vadd.f32 %v434_v31, %v1043_v19  ;;  %v458_v36 = vadd.f32 %v457_v33, %v451_v29 }
 0x109   : > { %v436_v37 = vadd.f32 %v1031_v13, %v435_v34  ;;  %v459_v39 = vadd.f32 %v458_v36, %v452_v32 }
 0x10b   : > { %v437_v40 = vadd.f32 %v1039_v17, %v436_v37  ;;  %v460_v41 = vadd.f32 %v459_v39, %v453_v35 }
 0x10d   : > { %v438_v42 = vrot.slane %v437_v40, 4  ;;  %v461_v43 = vadd.f32 %v460_v41, %v454_v38 }
 0x10f   : > { %v439_v44 = vadd.f32 %v438_v42, %v437_v40  ;;  %v462_v45 = vrot.slane %v461_v43, 4 }
 0x111   : > { %v440_v46 = vrot.slane %v439_v44, 2  ;;  %v463_v47 = vadd.f32 %v462_v45, %v461_v43 }
 0x113   : > { %v441_v48 = vadd.f32 %v440_v46, %v439_v44  ;;  %v464_v49 = vrot.slane %v463_v47, 2 }
 0x115   : > { %v442_v50 = vrot.slane %v441_v48, 1  ;;  %v465_v51 = vadd.f32 %v464_v49, %v463_v47 }
 0x117   : > { %v443_v53 = vadd.f32 %v442_v50, %v441_v48  ;;  %v466_v54 = vrot.slane %v465_v51, 1 }
 0x119   : > { %v444_v56 = vadd.f32 %v443_v53, %v430_v52  ;;  %v467_v57 = vadd.f32 %v466_v54, %v465_v51 }
 0x11b   : > { %445 = vst [vmem:[#allocation2] sm:$0x1] %v444_v56  ;;  %v468_v58 = vadd.f32 %v467_v57, %v446_v55 }
 0x11d   : > { %469 = vst [vmem:[#allocation3] sm:$0x1] %v468_v58 }
 0x11e PF: > { %p470_p11 = scmp.eq.s32.totalorder %s909_s16, 1 }
 0x120   : > { %p471_p12 = pnand %p470_p11, %p416_p7 }
 0x122   : > { %474 = sbr.rel (%p471_p12) target bundleno = 327 (0x147), region = 48 }
 0x127   : > { %v475_v59 = vld [vmem:[#allocation2] sm:$0x1]  ;;  %v477_v60 = vld [vmem:[#allocation3] sm:$0x1] }
 0x128   : > { %v476_v61 = vmul.f32 0.0078125, %v475_v59  ;;  %v478_v62 = vmul.f32 0.0078125, %v477_v60  ;;  %v482_v3 = vld [vmem:[%s1109_s2] sm:$0x1] }
 0x129   : > { %v487_v6 = vld [vmem:[%s1110_s3] sm:$0x1] }
 0x12a   : > { %v479_v63 = vmul.f32 %v476_v61, %v476_v61 }
 0x12c   : > { %v480_v0 = vsub.f32 %v478_v62, %v479_v63 }
 0x12e   : > { %v481_v1 = vmax.f32 %v480_v0, 0.0 }
 0x130   : > { %v483_v2 = vadd.f32 1e-05, %v481_v1 }
 0x132   : > { %881 = vrsqrt.f32 %v483_v2 }
 0x13f   : > { %v882_v4 = vpop.eup %881 }
 0x140   : > { %v485_v5 = vmul.f32 %v882_v4, %v482_v3 }
 0x142   : > { %486 = vst [vmem:[#allocation4] sm:$0x1] %v485_v5  ;;  %v488_v7 = vmul.f32 %v485_v5, %v476_v61 }
 0x144   : > { %v489_v8 = vsub.f32 %v487_v6, %v488_v7 }
 0x146   : > { %490 = vst [vmem:[#allocation5] sm:$0x1] %v489_v8 }
 0x147 PF: > { %p729_p13 = scmp.ne.s32.totalorder %s909_s16, 1 }
 0x149   : > { %493 = sbr.rel (%p729_p13) target bundleno = 345 (0x159), region = 52 }
 0x14e   : > { %v730_v9 = vld [vmem:[#allocation4] ss:$0 sm:$0xff]  ;;  %v731_v10 = vld [vmem:[#allocation5] ss:$0 sm:$0xff] }
 0x14f   : > { %v501_v11 = vmul.f32 %v730_v9, %v1033_v14  ;;  %v502_v20 = vmul.f32 %v730_v9, %v1041_v18  ;;  %v503_v21 = vmul.f32 %v1029_v12, %v730_v9  ;;  %v504_v22 = vmul.f32 %v1037_v16, %v730_v9 }
 0x150   : > { %v505_v23 = vmul.f32 %v730_v9, %v1035_v15  ;;  %v506_v24 = vmul.f32 %v730_v9, %v1043_v19  ;;  %v507_v25 = vmul.f32 %v1031_v13, %v730_v9  ;;  %v508_v26 = vmul.f32 %v1039_v17, %v730_v9 }
 0x151   : > { %v516_v27 = vadd.f32 %v731_v10, %v501_v11  ;;  %v517_v28 = vadd.f32 %v731_v10, %v502_v20  ;;  %v518_v29 = vadd.f32 %v731_v10, %v503_v21  ;;  %v519_v30 = vadd.f32 %v731_v10, %v504_v22 }
 0x152   : > { %v520_v31 = vadd.f32 %v731_v10, %v505_v23  ;;  %v521_v14 = vadd.f32 %v731_v10, %v506_v24  ;;  %v522_v18 = vadd.f32 %v731_v10, %v507_v25  ;;  %v523_v12 = vadd.f32 %v731_v10, %v508_v26 }
 0x153   : > { %v524_v16 = vmax.f32 %v516_v27, 0.0  ;;  %v525_v15 = vmax.f32 %v517_v28, 0.0  ;;  %v526_v32 = vmax.f32 %v518_v29, 0.0  ;;  %v527_v19 = vmax.f32 %v519_v30, 0.0 }
 0x154   : > { %v528_v33 = vmax.f32 %v520_v31, 0.0  ;;  %v529_v13 = vmax.f32 %v521_v14, 0.0  ;;  %v530_v34 = vmax.f32 %v522_v18, 0.0  ;;  %v531_v17 = vmax.f32 %v523_v12, 0.0 }
 0x155   : > { %v756_v35 = vpack.c.bf16 %v525_v15, %v524_v16  ;;  %v761_v36 = vpack.c.bf16 %v527_v19, %v526_v32 }
 0x156   : > { %v766_v37 = vpack.c.bf16 %v529_v13, %v528_v33  ;;  %v771_v38 = vpack.c.bf16 %v531_v17, %v530_v34 }
 0x157   : > { %757 = vst [vmem:[%s1004_s11] sm:$0xff] %v756_v35   ;;  %773 = vst [vmem:[%s1004_s11 + $0x8] sm:$0xff] %v761_v36  }
 0x158   : > { %774 = vst [vmem:[%s1004_s11 + $0x10] sm:$0xff] %v766_v37   ;;  %775 = vst [vmem:[%s1004_s11 + $0x18] sm:$0xff] %v771_v38  }
 0x159 PF: > { %s14_s19 = sadd.s32 1, %s921_s19   ;;  %s1112_s15 = smov %s913_s17 }
 0x15a   : > { %p11_p0 = scmp.ge.s32.totalorder %s14_s19, 6   ;;  %s1113_s16 = smov %s917_s18 }
 0x15b   : > { %s1114_s17 = smov %s1117_s20  ;;  %s1115_s18 = smov %s1121_s21 }
 0x15c   :  { %13 = sbr.rel (!%p11_p0) target bundleno = 3 (0x3), region = 82 }

// kernel: pointnet_set_abstraction_group_all.5
= control target key start
LH: loop header
LB: loop body
LE: loop exit
PB: predicated region body
PF: predicated region fallthrough
CT: control target
= control target key end

     0   :  { %s843_s15 = smov 0   ;;  %s845_s16 = smov 0   ;;  %s1003_s0 = inlined_call_operand.vmem [shape: bf16[2,64,128], index: 0, kind: input, shape index: {}]   ;;  %s1004_s1 = inlined_call_operand.vmem [shape: bf16[128,128], index: 1, kind: input, shape index: {}]   ;;  %s1005_s2 = inlined_call_operand.vmem [shape: f32[1,128], index: 2, kind: input, shape index: {}]   ;;  %s1006_s3 = inlined_call_operand.vmem [shape: f32[1,128], index: 3, kind: input, shape index: {}]   ;;  %s1007_s4 = inlined_call_operand.vmem [shape: f32[2,1,128], index: 4, kind: output, shape index: {}]  }
   0x1   :  { %s847_s17 = smov 0   ;;  %s849_s18 = smov 0  }
   0x2   :  { %s851_s19 = smov 0  }
   0x3 LB: > { %s29_s20 = sadd.s32 1, %s807_s17  ;;  %s33_s21 = sadd.s32 1, %s811_s18  ;;  %s815_s19 = sphi %s851_s19, %s14_s19   ;;  %s811_s18 = sphi %s849_s18, %s1011_s18   ;;  %s807_s17 = sphi %s847_s17, %s1010_s17   ;;  %s803_s16 = sphi %s845_s16, %s1009_s16   ;;  %s799_s15 = sphi %s843_s15, %s1008_s15  }
   0x4   : > { %p31_p0 = scmp.ge.s32.totalorder %s29_s20, 2  ;;  %p646_p1 = scmp.ge.s32.totalorder %s815_s19, 1 }
   0x5   : > { %p190_p2 = scmp.lt.s32.totalorder %s815_s19, 5 }
   0x6   : > { %s1013_s20 = smov (%p31_p0, %s29_s20), 0  ;;  %s1015_s21 = smov (!%p31_p0, %s33_s21), %s811_s18 }
   0x7   : > { %p191_p3 = pnand %p646_p1, %p190_p2  ;;  %p35_p4 = scmp.ge.s32.totalorder %s1015_s21, 2 }
   0x8   : > { %s229_s22 = smul.u32 (!%p191_p3), %s799_s15, %s803_s16  ;;  %p220_p5 = scmp.lt.s32.totalorder (!%p191_p3), %s799_s15, 1 }
   0x9   : > { %s1017_s21 = smov (%p35_p4, %s1015_s21), 0  ;;  %194 = sbr.rel (%p191_p3) target bundleno = 361 (0x169), region = 36 }
   0xa   : > { %p230_p6 = scmp.lt.s32.totalorder (!%p191_p3), %s229_s22, 1  ;;  %p396_p7 = scmp.eq.s32.totalorder (!%p191_p3), %s799_s15, 0 }
   0xb   : > { %p400_p8 = scmp.eq.s32.totalorder (!%p191_p3), %s803_s16, 0 }
   0xd   : > { %p401_p9 = pnand (!%p191_p3), %p400_p8, %p396_p7 }
   0xe   : > { %v763_v0 = vld [vmem:[%s1004_s1 + $0x38] sm:$0xff]   ;;  %v764_v1 = vld [vmem:[%s1004_s1 + $0x30] sm:$0xff]   ;;  %s221_s27 = scalar_select %p220_p5, %s799_s15, 1  ;;  %v765_v2 = vld [vmem:[%s1004_s1 + $0x28] sm:$0xff]  }
   0xf   : > { %682 = vmatprep.subr.bf16.mxu0 %v763_v0  ;;  %706 = vmatprep.subr.bf16.mxu1 %v763_v0  ;;  %s1019_s22 = smov (!%p230_p6, %s229_s22), 1  ;;  %v766_v3 = vld [vmem:[%s1004_s1 + $0x20] sm:$0xff]   ;;  %v767_v6 = vld [vmem:[%s1004_s1 + $0x18] sm:$0xff]   ;;  %v768_v7 = vld [vmem:[%s1004_s1 + $0x10] sm:$0xff]  }
  0x10   : > { %683 = vmatpush3.bf16.msra.mxu0 %v763_v0  ;;  %714 = vmatpush3.bf16.msra.mxu1 %v763_v0  ;;  %s668_s30 = sshll.u32 %s221_s27, 5  ;;  %s232_s7 = scalar_lea.vmem %s1007_s4, %s1019_s22  ;;  %v769_v8 = vld [vmem:[%s1004_s1 + $0x8] sm:$0xff]   ;;  %v770_v9 = vld [vmem:[%s1004_s1] sm:$0xff]  }
  0x11   : > { %684 = vmatprep.subr.bf16.mxu0 %v764_v1  ;;  %707 = vmatprep.subr.bf16.mxu1 %v764_v1  ;;  %s899_s10 = scalar_lea.vmem %s1003_s0, %s668_s30 }
  0x12   : > { %v771_v4 = vld [vmem:[%s899_s10] sm:$0xff]   ;;  %v772_v5 = vld [vmem:[%s899_s10 + $0x10] sm:$0xff]   ;;  %v773_v10 = vld [vmem:[%s899_s10 + $0x8] sm:$0xff]  }
  0x13   : > { %698 = vmatprep.mubr.bf16.mxu0 %v771_v4  ;;  %702 = vmatprep.mubr.bf16.mxu1 %v772_v5  ;;  %v774_v11 = vld [vmem:[%s899_s10 + $0x18] sm:$0xff]  }
  0x14   : > { %685 = vmatpush3.bf16.msra.mxu0 %v764_v1  ;;  %715 = vmatpush3.bf16.msra.mxu1 %v764_v1 }
  0x15   : > { %686 = vmatprep.subr.bf16.mxu0 %v765_v2  ;;  %708 = vmatprep.subr.bf16.mxu1 %v765_v2 }
  0x18   : > { %687 = vmatpush3.bf16.msra.mxu0 %v765_v2  ;;  %716 = vmatpush3.bf16.msra.mxu1 %v765_v2 }
  0x19   : > { %688 = vmatprep.subr.bf16.mxu0 %v766_v3  ;;  %709 = vmatprep.subr.bf16.mxu1 %v766_v3 }
  0x1c   : > { %689 = vmatpush3.bf16.msra.mxu0 %v766_v3  ;;  %717 = vmatpush3.bf16.msra.mxu1 %v766_v3 }
  0x1d   : > { %690 = vmatprep.subr.bf16.mxu0 %v767_v6  ;;  %710 = vmatprep.subr.bf16.mxu1 %v767_v6 }
  0x20   : > { %691 = vmatpush3.bf16.msra.mxu0 %v767_v6  ;;  %718 = vmatpush3.bf16.msra.mxu1 %v767_v6 }
  0x21   : > { %692 = vmatprep.subr.bf16.mxu0 %v768_v7  ;;  %711 = vmatprep.subr.bf16.mxu1 %v768_v7 }
  0x24   : > { %693 = vmatpush3.bf16.msra.mxu0 %v768_v7  ;;  %719 = vmatpush3.bf16.msra.mxu1 %v768_v7 }
  0x25   : > { %694 = vmatprep.subr.bf16.mxu0 %v769_v8  ;;  %712 = vmatprep.subr.bf16.mxu1 %v769_v8 }
  0x28   : > { %695 = vmatpush3.bf16.msra.mxu0 %v769_v8  ;;  %720 = vmatpush3.bf16.msra.mxu1 %v769_v8 }
  0x29   : > { %696 = vmatprep.subr.bf16.mxu0 %v770_v9  ;;  %713 = vmatprep.subr.bf16.mxu1 %v770_v9 }
  0x2c   : > { %697 = vmatpush3.bf16.msra.mxu0 %v770_v9  ;;  %721 = vmatpush3.bf16.msra.mxu1 %v770_v9 }
  0x2f   : > { %699 = vmatmul.mubr.bf16.vlgmr.msra.gmra.mxu0 %v773_v10  ;;  %703 = vmatmul.mubr.bf16.vlgmr.msra.gmra.mxu1 %v774_v11 }
  0xef   : > { %v924_v12 = vpop.f32.mrf.mxu0  ;;  %v926_v13 = vpop.f32.mrf.mxu1 }
  0xf1   : > { %v928_v14 = vpop.f32.mrf.mxu0  ;;  %v930_v15 = vpop.f32.mrf.mxu1  ;;  %404 = sbr.rel (%p401_p9) target bundleno = 248 (0xf8), region = 40 }
  0xf3   : > { %v932_v16 = vpop.f32.mrf.mxu0  ;;  %v934_v17 = vpop.f32.mrf.mxu1 }
  0xf5   : > { %v936_v18 = vpop.f32.mrf.mxu0  ;;  %v938_v19 = vpop.f32.mrf.mxu1 }
  0xf6   : > { %v817_v20 = vmov 0.0  }
  0xf7   : > { %405 = vst [vmem:[#allocation2] sm:$0x1] %v817_v20  ;;  %406 = vst [vmem:[#allocation3] sm:$0x1] %v817_v20 }
  0xf8 PF: > { %p662_p10 = scmp.ne.s32.totalorder %s803_s16, 0 }
  0xfa   : > { %409 = sbr.rel (%p662_p10) target bundleno = 286 (0x11e), region = 44 }
  0xff   : > { %v411_v21 = vadd.f32 %v936_v18, %v928_v14  ;;  %v427_v22 = vmul.f32 %v928_v14, %v928_v14  ;;  %v428_v23 = vmul.f32 %v936_v18, %v936_v18  ;;  %v429_v24 = vmul.f32 %v924_v12, %v924_v12  ;;  %v410_v52 = vld [vmem:[#allocation2] sm:$0x1]  ;;  %v426_v55 = vld [vmem:[#allocation3] sm:$0x1] }
 0x100   : > { %v430_v26 = vmul.f32 %v932_v16, %v932_v16  ;;  %v431_v29 = vmul.f32 %v930_v15, %v930_v15  ;;  %v432_v32 = vmul.f32 %v938_v19, %v938_v19  ;;  %v433_v35 = vmul.f32 %v926_v13, %v926_v13 }
 0x101   : > { %v412_v25 = vadd.f32 %v924_v12, %v411_v21  ;;  %v435_v27 = vadd.f32 %v428_v23, %v427_v22  ;;  %v434_v38 = vmul.f32 %v934_v17, %v934_v17 }
 0x103   : > { %v413_v28 = vadd.f32 %v932_v16, %v412_v25  ;;  %v436_v30 = vadd.f32 %v435_v27, %v429_v24 }
 0x105   : > { %v414_v31 = vadd.f32 %v413_v28, %v930_v15  ;;  %v437_v33 = vadd.f32 %v436_v30, %v430_v26 }
 0x107   : > { %v415_v34 = vadd.f32 %v414_v31, %v938_v19  ;;  %v438_v36 = vadd.f32 %v437_v33, %v431_v29 }
 0x109   : > { %v416_v37 = vadd.f32 %v926_v13, %v415_v34  ;;  %v439_v39 = vadd.f32 %v438_v36, %v432_v32 }
 0x10b   : > { %v417_v40 = vadd.f32 %v934_v17, %v416_v37  ;;  %v440_v41 = vadd.f32 %v439_v39, %v433_v35 }
 0x10d   : > { %v418_v42 = vrot.slane %v417_v40, 4  ;;  %v441_v43 = vadd.f32 %v440_v41, %v434_v38 }
 0x10f   : > { %v419_v44 = vadd.f32 %v418_v42, %v417_v40  ;;  %v442_v45 = vrot.slane %v441_v43, 4 }
 0x111   : > { %v420_v46 = vrot.slane %v419_v44, 2  ;;  %v443_v47 = vadd.f32 %v442_v45, %v441_v43 }
 0x113   : > { %v421_v48 = vadd.f32 %v420_v46, %v419_v44  ;;  %v444_v49 = vrot.slane %v443_v47, 2 }
 0x115   : > { %v422_v50 = vrot.slane %v421_v48, 1  ;;  %v445_v51 = vadd.f32 %v444_v49, %v443_v47 }
 0x117   : > { %v423_v53 = vadd.f32 %v422_v50, %v421_v48  ;;  %v446_v54 = vrot.slane %v445_v51, 1 }
 0x119   : > { %v424_v56 = vadd.f32 %v423_v53, %v410_v52  ;;  %v447_v57 = vadd.f32 %v446_v54, %v445_v51 }
 0x11b   : > { %425 = vst [vmem:[#allocation2] sm:$0x1] %v424_v56  ;;  %v448_v58 = vadd.f32 %v447_v57, %v426_v55 }
 0x11d   : > { %449 = vst [vmem:[#allocation3] sm:$0x1] %v448_v58 }
 0x11e PF: > { %p450_p11 = scmp.eq.s32.totalorder %s803_s16, 1 }
 0x120   : > { %p451_p12 = pnand %p450_p11, %p396_p7 }
 0x122   : > { %454 = sbr.rel (%p451_p12) target bundleno = 327 (0x147), region = 48 }
 0x127   : > { %v455_v59 = vld [vmem:[#allocation2] sm:$0x1]  ;;  %v457_v60 = vld [vmem:[#allocation3] sm:$0x1] }
 0x128   : > { %v456_v61 = vmul.f32 0.0078125, %v455_v59  ;;  %v458_v62 = vmul.f32 0.0078125, %v457_v60  ;;  %v462_v3 = vld [vmem:[%s1005_s2] sm:$0x1] }
 0x129   : > { %v467_v6 = vld [vmem:[%s1006_s3] sm:$0x1] }
 0x12a   : > { %v459_v63 = vmul.f32 %v456_v61, %v456_v61 }
 0x12c   : > { %v460_v0 = vsub.f32 %v458_v62, %v459_v63 }
 0x12e   : > { %v461_v1 = vmax.f32 %v460_v0, 0.0 }
 0x130   : > { %v463_v2 = vadd.f32 1e-05, %v461_v1 }
 0x132   : > { %775 = vrsqrt.f32 %v463_v2 }
 0x13f   : > { %v776_v4 = vpop.eup %775 }
 0x140   : > { %v465_v5 = vmul.f32 %v776_v4, %v462_v3 }
 0x142   : > { %466 = vst [vmem:[#allocation4] sm:$0x1] %v465_v5  ;;  %v468_v7 = vmul.f32 %v465_v5, %v456_v61 }
 0x144   : > { %v469_v8 = vsub.f32 %v467_v6, %v468_v7 }
 0x146   : > { %470 = vst [vmem:[#allocation5] sm:$0x1] %v469_v8 }
 0x147 PF: > { %p663_p13 = scmp.ne.s32.totalorder %s803_s16, 1 }
 0x149   : > { %473 = sbr.rel (%p663_p13) target bundleno = 361 (0x169), region = 52 }
 0x14e   : > { %v664_v9 = vld [vmem:[#allocation4] ss:$0 sm:$0xff]  ;;  %v665_v10 = vld [vmem:[#allocation5] ss:$0 sm:$0xff] }
 0x14f   : > { %v481_v11 = vmul.f32 %v664_v9, %v928_v14  ;;  %v482_v20 = vmul.f32 %v664_v9, %v936_v18  ;;  %v483_v21 = vmul.f32 %v924_v12, %v664_v9  ;;  %v484_v22 = vmul.f32 %v932_v16, %v664_v9 }
 0x150   : > { %v485_v23 = vmul.f32 %v664_v9, %v930_v15  ;;  %v486_v24 = vmul.f32 %v664_v9, %v938_v19  ;;  %v487_v25 = vmul.f32 %v926_v13, %v664_v9  ;;  %v488_v26 = vmul.f32 %v934_v17, %v664_v9 }
 0x151   : > { %v496_v27 = vadd.f32 %v665_v10, %v481_v11  ;;  %v497_v28 = vadd.f32 %v665_v10, %v482_v20  ;;  %v498_v29 = vadd.f32 %v665_v10, %v483_v21  ;;  %v499_v30 = vadd.f32 %v665_v10, %v484_v22 }
 0x152   : > { %v500_v31 = vadd.f32 %v665_v10, %v485_v23  ;;  %v501_v14 = vadd.f32 %v665_v10, %v486_v24  ;;  %v502_v32 = vadd.f32 %v665_v10, %v487_v25  ;;  %v503_v18 = vadd.f32 %v665_v10, %v488_v26 }
 0x153   : > { %v504_v33 = vmax.f32 %v496_v27, 0.0  ;;  %v505_v12 = vmax.f32 %v497_v28, 0.0  ;;  %v506_v34 = vmax.f32 %v498_v29, 0.0  ;;  %v507_v16 = vmax.f32 %v499_v30, 0.0 }
 0x154   : > { %v508_v35 = vmax.f32 %v500_v31, 0.0  ;;  %v509_v15 = vmax.f32 %v501_v14, 0.0  ;;  %v510_v19 = vmax.f32 %v502_v32, 0.0  ;;  %v511_v36 = vmax.f32 %v503_v18, 0.0 }
 0x156   : > { %v547_v13 = vmax.f32 %v504_v33, %v508_v35  ;;  %v548_v37 = vmax.f32 %v505_v12, %v509_v15  ;;  %v549_v17 = vmax.f32 %v506_v34, %v510_v19  ;;  %v550_v38 = vmax.f32 %v507_v16, %v511_v36 }
 0x158   : > { %v551_v39 = vmax.f32 %v547_v13, %v548_v37  ;;  %v552_v40 = vmax.f32 %v549_v17, %v550_v38 }
 0x15a   : > { %v553_v41 = vmax.f32 %v551_v39, %v552_v40 }
 0x15c   : > { %v554_v42 = vrot.slane %v553_v41, 4 }
 0x15e   : > { %v555_v43 = vmax.f32 %v553_v41, %v554_v42 }
 0x160   : > { %v556_v44 = vrot.slane %v555_v43, 2 }
 0x162   : > { %v557_v45 = vmax.f32 %v555_v43, %v556_v44 }
 0x164   : > { %v558_v46 = vrot.slane %v557_v45, 1 }
 0x166   : > { %v559_v47 = vmax.f32 %v557_v45, %v558_v46 }
 0x168   : > { %563 = vst [vmem:[%s232_s7] sm:$0x1] %v559_v47 }
 0x169 PF: > { %s14_s19 = sadd.s32 1, %s815_s19   ;;  %s1008_s15 = smov %s807_s17 }
 0x16a   : > { %p11_p0 = scmp.ge.s32.totalorder %s14_s19, 6   ;;  %s1009_s16 = smov %s811_s18 }
 0x16b   : > { %s1010_s17 = smov %s1013_s20  ;;  %s1011_s18 = smov %s1017_s21 }
 0x16c   :  { %13 = sbr.rel (!%p11_p0) target bundleno = 3 (0x3), region = 90 }

</bundles_post_ra>
